<compile_context>
chip_gen: v7x
topology: tpu7x:2x2x1
jax: 0.10.0
libtpu: 0.0.40
codegen_flags: <defaults>
</compile_context>

<pallas_src>
import functools

import jax
import jax.numpy as jnp
from jax.experimental import pallas as pl
from jax.experimental.pallas import tpu as pltpu


def _deconv_bn_relu_kernel(x_ref, w_ref, p_ref, o_ref, *, n_batch, kk, cout, inv_count, eps):
    # x_ref: (N, Cin, H*W)              natural NCHW layout, H*W on the lane axis
    # w_ref: (CO, Cin)                  rows ordered (ki, kj, co)
    # p_ref: (Cout, 2)                  column 0 = gamma, column 1 = beta
    # o_ref: (CO, N*H*W)                rows ordered (ki, kj, co), columns ordered (n, i, j)

    # Assemble the (Cin, N*H*W) operand and do the whole deconv as ONE MXU matmul.
    xcat = jnp.concatenate([x_ref[n] for n in range(n_batch)], axis=1)      # (Cin, M)
    y = jnp.dot(w_ref[...], xcat, preferred_element_type=jnp.float32)       # (CO, M)
    # (conv bias intentionally omitted: cancelled exactly by the BN mean subtraction below)

    # --- BatchNorm2d training-mode statistics per output channel ---------------------------
    # Rows of y come in kk contiguous (Cout, M) blocks (one per kernel position); summing the
    # blocks then reducing over lanes gives the per-channel sums over all N*Hout*Wout elements.
    blk0 = y[0:cout, :]
    psum = blk0
    psq = blk0 * blk0
    for g in range(1, kk):
        blk = y[g * cout:(g + 1) * cout, :]
        psum = psum + blk
        psq = psq + blk * blk
    chansum = jnp.sum(psum, axis=1, keepdims=True)                           # (Cout, 1)
    chansq = jnp.sum(psq, axis=1, keepdims=True)                             # (Cout, 1)

    mean = chansum * inv_count
    var = chansq * inv_count - mean * mean                                   # biased variance
    inv = jax.lax.rsqrt(var + eps)

    # Folded BN affine: out = y * scale + shift
    scale = p_ref[:, 0:1] * inv                                              # (Cout, 1)
    shift = p_ref[:, 1:2] - mean * scale                                     # (Cout, 1)

    # --- normalize + ReLU, 2 VALU ops/element over lane-dense (Cout, M) blocks --------------
    for g in range(kk):
        blk = y[g * cout:(g + 1) * cout, :]
        o_ref[g * cout:(g + 1) * cout, :] = jnp.maximum(
            blk * scale + shift, 0.0).astype(o_ref.dtype)


def base_block_deconv_relu(x, conv_w, conv_b, bn_gamma, bn_beta, *, eps=1e-5):
    """x: (N, Cin, H, W) float32. conv_w: (Cin, Cout, kH, kW) (PyTorch ConvTranspose2d layout).
    Assumes stride == (kH, kW), padding = 0. conv_b is accepted for drop-in compatibility but is
    mathematically cancelled by training-mode BatchNorm and therefore never touched."""
    del conv_b  # cancelled by BN mean subtraction
    N, Cin, H, W = x.shape
    _, Cout, kH, kW = conv_w.shape
    kk = kH * kW
    CO = Cout * kk
    HW = H * W
    M = N * HW

    # Glue (plain JAX, all tiny / free): no transpose of x, only a view-reshape.
    x3 = x.reshape(N, Cin, HW)                                               # (N, Cin, HW)
    w_t = jnp.transpose(conv_w, (2, 3, 1, 0)).reshape(CO, Cin)               # rows = (ki, kj, co)
    params = jnp.stack([bn_gamma, bn_beta], axis=1)                          # (Cout, 2)

    count = float(N * HW * kk)                                               # = N * Hout * Wout
    kernel = functools.partial(_deconv_bn_relu_kernel, n_batch=N, kk=kk, cout=Cout,
                               inv_count=1.0 / count, eps=float(eps))

    out_mat = pl.pallas_call(
        kernel,
        out_shape=jax.ShapeDtypeStruct((CO, M), x.dtype),
        grid=(1,),
        in_specs=[
            pl.BlockSpec((N, Cin, HW), lambda i: (0, 0, 0)),
            pl.BlockSpec((CO, Cin), lambda i: (0, 0)),
            pl.BlockSpec((Cout, 2), lambda i: (0, 0)),
        ],
        out_specs=pl.BlockSpec((CO, M), lambda i: (0, 0)),
        compiler_params=pltpu.CompilerParams(dimension_semantics=("arbitrary",)),
    )(x3, w_t, params)

    # Scatter the (ki, kj, co) rows / (n, i, j) columns back into the NCHW output grid.
    out6 = out_mat.reshape(kH, kW, Cout, N, H, W)
    out = jnp.transpose(out6, (3, 2, 4, 0, 5, 1)).reshape(N, Cout, H * kH, W * kW)
    return out


def _reference(x, conv_w, conv_b, bn_gamma, bn_beta, eps=1e-5):
    """Pure-JAX reference matching PyTorch ConvTranspose2d(stride=k) + BatchNorm2d(train) + relu_."""
    N, Cin, H, W = x.shape
    _, Cout, kH, kW = conv_w.shape
    y = jnp.einsum("ncij,cokl->noikjl", x, conv_w)                           # (N, Cout, H, kH, W, kW)
    y = y.reshape(N, Cout, H * kH, W * kW) + conv_b[None, :, None, None]
    mean = jnp.mean(y, axis=(0, 2, 3), keepdims=True)
    var = jnp.mean((y - mean) ** 2, axis=(0, 2, 3), keepdims=True)           # biased variance
    yhat = (y - mean) / jnp.sqrt(var + eps)
    out = yhat * bn_gamma[None, :, None, None] + bn_beta[None, :, None, None]
    return jnp.maximum(out, 0.0)


if __name__ == "__main__":
    key = jax.random.PRNGKey(0)
    k_x, k_w, k_b, k_g, k_be = jax.random.split(key, 5)

    N, Cin, Cout, H, W, K = 2, 4, 8, 16, 16, 2

    x = jax.random.normal(k_x, (N, Cin, H, W), dtype=jnp.float32)
    conv_w = 0.1 * jax.random.normal(k_w, (Cin, Cout, K, K), dtype=jnp.float32)
    conv_b = 0.1 * jax.random.normal(k_b, (Cout,), dtype=jnp.float32)
    bn_gamma = 1.0 + 0.1 * jax.random.normal(k_g, (Cout,), dtype=jnp.float32)
    bn_beta = 0.1 * jax.random.normal(k_be, (Cout,), dtype=jnp.float32)

    out = base_block_deconv_relu(x, conv_w, conv_b, bn_gamma, bn_beta)
    out = jax.block_until_ready(out)

    ref = _reference(x, conv_w, conv_b, bn_gamma, bn_beta)
    assert out.shape == (N, Cout, H * K, W * K), out.shape
    if not jnp.allclose(out, ref, rtol=1e-4, atol=1e-4):
        max_err = float(jnp.max(jnp.abs(out - ref)))
        raise AssertionError(f"Pallas kernel mismatch vs reference, max abs err={max_err}")

    print("KERNEL_OK")
</pallas_src>

<mosaic_0001>
module attributes {stable_mosaic.version = 11 : i64} {
  func.func @_deconv_bn_relu_kernel(%arg0: i32, %arg1: memref<2x4x256xf32, #tpu.memory_space<vmem>>, %arg2: memref<32x4xf32, #tpu.memory_space<vmem>>, %arg3: memref<8x2xf32, #tpu.memory_space<vmem>>, %arg4: memref<32x512xf32, #tpu.memory_space<vmem>>) attributes {dimension_semantics = [#tpu.dimension_semantics<arbitrary>], iteration_bounds = array<i64: 1>, scalar_prefetch = 0 : i64, scratch_operands = 0 : i64, tpu.core_type = #tpu.core_type<tc>, window_params = [{pipeline_mode = #tpu.pipeline_mode<synchronous>, transform_indices = @transform_0, window_bounds = array<i64: 2, 4, 256>}, {pipeline_mode = #tpu.pipeline_mode<synchronous>, transform_indices = @transform_1, window_bounds = array<i64: 32, 4>}, {pipeline_mode = #tpu.pipeline_mode<synchronous>, transform_indices = @transform_2, window_bounds = array<i64: 8, 2>}, {pipeline_mode = #tpu.pipeline_mode<synchronous>, transform_indices = @transform_3, window_bounds = array<i64: 32, 512>}]} {
    %c0 = arith.constant 0 : index
    %c0_0 = arith.constant 0 : index
    %c0_1 = arith.constant 0 : index
    %0 = vector.load %arg1[%c0, %c0_0, %c0_1] : memref<2x4x256xf32, #tpu.memory_space<vmem>>, vector<1x4x256xf32>
    %1 = vector.shape_cast %0 : vector<1x4x256xf32> to vector<4x256xf32>
    %c1 = arith.constant 1 : index
    %c0_2 = arith.constant 0 : index
    %c0_3 = arith.constant 0 : index
    %2 = vector.load %arg1[%c1, %c0_2, %c0_3] : memref<2x4x256xf32, #tpu.memory_space<vmem>>, vector<1x4x256xf32>
    %3 = vector.shape_cast %2 : vector<1x4x256xf32> to vector<4x256xf32>
    %4 = tpu.concatenate %1, %3 in 1 : vector<4x256xf32>, vector<4x256xf32> -> vector<4x512xf32>
    %c0_4 = arith.constant 0 : index
    %c0_5 = arith.constant 0 : index
    %5 = vector.load %arg2[%c0_4, %c0_5] : memref<32x4xf32, #tpu.memory_space<vmem>>, vector<32x4xf32>
    %cst = arith.constant dense<0.000000e+00> : vector<32x512xf32>
    %6 = tpu.matmul %5, %4, %cst {dimension_numbers = #tpu.dot_dimension_numbers<[1], [0], [0], [1], [0, 0, 1, 1], [], []>} : vector<32x4xf32>, vector<4x512xf32>, vector<32x512xf32> -> vector<32x512xf32>
    %7 = vector.extract_strided_slice %6 {offsets = [0, 0], sizes = [8, 512], strides = [1, 1]} : vector<32x512xf32> to vector<8x512xf32>
    %8 = arith.mulf %7, %7 : vector<8x512xf32>
    %9 = vector.extract_strided_slice %6 {offsets = [8, 0], sizes = [8, 512], strides = [1, 1]} : vector<32x512xf32> to vector<8x512xf32>
    %10 = arith.addf %7, %9 : vector<8x512xf32>
    %11 = arith.mulf %9, %9 : vector<8x512xf32>
    %12 = arith.addf %8, %11 : vector<8x512xf32>
    %13 = vector.extract_strided_slice %6 {offsets = [16, 0], sizes = [8, 512], strides = [1, 1]} : vector<32x512xf32> to vector<8x512xf32>
    %14 = arith.addf %10, %13 : vector<8x512xf32>
    %15 = arith.mulf %13, %13 : vector<8x512xf32>
    %16 = arith.addf %12, %15 : vector<8x512xf32>
    %17 = vector.extract_strided_slice %6 {offsets = [24, 0], sizes = [8, 512], strides = [1, 1]} : vector<32x512xf32> to vector<8x512xf32>
    %18 = arith.addf %14, %17 : vector<8x512xf32>
    %19 = arith.mulf %17, %17 : vector<8x512xf32>
    %20 = arith.addf %16, %19 : vector<8x512xf32>
    %cst_6 = arith.constant dense<0.000000e+00> : vector<8xf32>
    %21 = vector.multi_reduction <add>, %18, %cst_6 [1] : vector<8x512xf32> to vector<8xf32>
    %22 = vector.shape_cast %21 : vector<8xf32> to vector<8x1xf32>
    %cst_7 = arith.constant dense<0.000000e+00> : vector<8xf32>
    %23 = vector.multi_reduction <add>, %20, %cst_7 [1] : vector<8x512xf32> to vector<8xf32>
    %24 = vector.shape_cast %23 : vector<8xf32> to vector<8x1xf32>
    %cst_8 = arith.constant 4.8828125E-4 : f32
    %25 = vector.broadcast %cst_8 : f32 to vector<8x1xf32>
    %26 = arith.mulf %22, %25 : vector<8x1xf32>
    %cst_9 = arith.constant 4.8828125E-4 : f32
    %27 = vector.broadcast %cst_9 : f32 to vector<8x1xf32>
    %28 = arith.mulf %24, %27 : vector<8x1xf32>
    %29 = arith.mulf %26, %26 : vector<8x1xf32>
    %30 = arith.subf %28, %29 : vector<8x1xf32>
    %cst_10 = arith.constant 9.99999974E-6 : f32
    %31 = vector.broadcast %cst_10 : f32 to vector<8x1xf32>
    %32 = arith.addf %30, %31 : vector<8x1xf32>
    %33 = math.rsqrt %32 : vector<8x1xf32>
    %c0_11 = arith.constant 0 : index
    %c0_12 = arith.constant 0 : index
    %34 = vector.load %arg3[%c0_11, %c0_12] : memref<8x2xf32, #tpu.memory_space<vmem>>, vector<8x1xf32>
    %35 = arith.mulf %34, %33 : vector<8x1xf32>
    %c0_13 = arith.constant 0 : index
    %c1_14 = arith.constant 1 : index
    %36 = vector.load %arg3[%c0_13, %c1_14] : memref<8x2xf32, #tpu.memory_space<vmem>>, vector<8x1xf32>
    %37 = arith.mulf %26, %35 : vector<8x1xf32>
    %38 = arith.subf %36, %37 : vector<8x1xf32>
    %39 = vector.extract_strided_slice %6 {offsets = [0, 0], sizes = [8, 512], strides = [1, 1]} : vector<32x512xf32> to vector<8x512xf32>
    %40 = vector.broadcast %35 : vector<8x1xf32> to vector<8x512xf32>
    %41 = arith.mulf %39, %40 : vector<8x512xf32>
    %42 = vector.broadcast %38 : vector<8x1xf32> to vector<8x512xf32>
    %43 = arith.addf %41, %42 : vector<8x512xf32>
    %cst_15 = arith.constant 0.000000e+00 : f32
    %44 = vector.broadcast %cst_15 : f32 to vector<8x512xf32>
    %45 = arith.maximumf %43, %44 : vector<8x512xf32>
    %c0_16 = arith.constant 0 : index
    %c0_17 = arith.constant 0 : index
    %46 = vector.load %arg4[%c0_16, %c0_17] : memref<32x512xf32, #tpu.memory_space<vmem>>, vector<8x512xf32>
    tpu.vector_store %arg4[%c0_16, %c0_17], %45 {strides = array<i32>} : memref<32x512xf32, #tpu.memory_space<vmem>>, vector<8x512xf32>,
    %47 = vector.extract_strided_slice %6 {offsets = [8, 0], sizes = [8, 512], strides = [1, 1]} : vector<32x512xf32> to vector<8x512xf32>
    %48 = vector.broadcast %35 : vector<8x1xf32> to vector<8x512xf32>
    %49 = arith.mulf %47, %48 : vector<8x512xf32>
    %50 = vector.broadcast %38 : vector<8x1xf32> to vector<8x512xf32>
    %51 = arith.addf %49, %50 : vector<8x512xf32>
    %cst_18 = arith.constant 0.000000e+00 : f32
    %52 = vector.broadcast %cst_18 : f32 to vector<8x512xf32>
    %53 = arith.maximumf %51, %52 : vector<8x512xf32>
    %c8 = arith.constant 8 : index
    %c0_19 = arith.constant 0 : index
    %54 = vector.load %arg4[%c8, %c0_19] : memref<32x512xf32, #tpu.memory_space<vmem>>, vector<8x512xf32>
    tpu.vector_store %arg4[%c8, %c0_19], %53 {strides = array<i32>} : memref<32x512xf32, #tpu.memory_space<vmem>>, vector<8x512xf32>,
    %55 = vector.extract_strided_slice %6 {offsets = [16, 0], sizes = [8, 512], strides = [1, 1]} : vector<32x512xf32> to vector<8x512xf32>
    %56 = vector.broadcast %35 : vector<8x1xf32> to vector<8x512xf32>
    %57 = arith.mulf %55, %56 : vector<8x512xf32>
    %58 = vector.broadcast %38 : vector<8x1xf32> to vector<8x512xf32>
    %59 = arith.addf %57, %58 : vector<8x512xf32>
    %cst_20 = arith.constant 0.000000e+00 : f32
    %60 = vector.broadcast %cst_20 : f32 to vector<8x512xf32>
    %61 = arith.maximumf %59, %60 : vector<8x512xf32>
    %c16 = arith.constant 16 : index
    %c0_21 = arith.constant 0 : index
    %62 = vector.load %arg4[%c16, %c0_21] : memref<32x512xf32, #tpu.memory_space<vmem>>, vector<8x512xf32>
    tpu.vector_store %arg4[%c16, %c0_21], %61 {strides = array<i32>} : memref<32x512xf32, #tpu.memory_space<vmem>>, vector<8x512xf32>,
    %63 = vector.extract_strided_slice %6 {offsets = [24, 0], sizes = [8, 512], strides = [1, 1]} : vector<32x512xf32> to vector<8x512xf32>
    %64 = vector.broadcast %35 : vector<8x1xf32> to vector<8x512xf32>
    %65 = arith.mulf %63, %64 : vector<8x512xf32>
    %66 = vector.broadcast %38 : vector<8x1xf32> to vector<8x512xf32>
    %67 = arith.addf %65, %66 : vector<8x512xf32>
    %cst_22 = arith.constant 0.000000e+00 : f32
    %68 = vector.broadcast %cst_22 : f32 to vector<8x512xf32>
    %69 = arith.maximumf %67, %68 : vector<8x512xf32>
    %c24 = arith.constant 24 : index
    %c0_23 = arith.constant 0 : index
    %70 = vector.load %arg4[%c24, %c0_23] : memref<32x512xf32, #tpu.memory_space<vmem>>, vector<8x512xf32>
    tpu.vector_store %arg4[%c24, %c0_23], %69 {strides = array<i32>} : memref<32x512xf32, #tpu.memory_space<vmem>>, vector<8x512xf32>,
    return
  }
  func.func @transform_0(%arg0: i32) -> (i32, i32, i32) {
    %c0_i32 = arith.constant 0 : i32
    %c0_i32_0 = arith.constant 0 : i32
    %c0_i32_1 = arith.constant 0 : i32
    %c0_i32_2 = arith.constant 0 : i32
    return %c0_i32, %c0_i32_0, %c0_i32_1 : i32, i32, i32
  }
  func.func @transform_1(%arg0: i32) -> (i32, i32) {
    %c0_i32 = arith.constant 0 : i32
    %c0_i32_0 = arith.constant 0 : i32
    %c0_i32_1 = arith.constant 0 : i32
    return %c0_i32, %c0_i32_0 : i32, i32
  }
  func.func @transform_2(%arg0: i32) -> (i32, i32) {
    %c0_i32 = arith.constant 0 : i32
    %c0_i32_0 = arith.constant 0 : i32
    %c0_i32_1 = arith.constant 0 : i32
    return %c0_i32, %c0_i32_0 : i32, i32
  }
  func.func @transform_3(%arg0: i32) -> (i32, i32) {
    %c0_i32 = arith.constant 0 : i32
    %c0_i32_0 = arith.constant 0 : i32
    %c0_i32_1 = arith.constant 0 : i32
    return %c0_i32, %c0_i32_0 : i32, i32
  }
}

</mosaic_0001>

<bundles_post_ra>
// kernel: tpu_custom_call.1
= control target key start
LH: loop header
LB: loop body
LE: loop exit
PB: predicated region body
PF: predicated region fallthrough
CT: control target
= control target key end

     0   :  { %vm39_vm0 = vcmask 1043456   ;;  %v430_v4 = vmov 0.0   ;;  %vm26_vm1 = vcmask 31744   ;;  %s577_s0 = inlined_call_operand.vmem [shape: f32[2,4,256], index: 0, kind: input, shape index: {}]   ;;  %s578_s1 = inlined_call_operand.vmem [shape: f32[32,4], index: 1, kind: input, shape index: {}]   ;;  %s579_s2 = inlined_call_operand.vmem [shape: f32[8,2], index: 2, kind: input, shape index: {}]   ;;  %s580_s3 = inlined_call_operand.hbm [shape: f32[32,512], index: 3, kind: output, shape index: {}]  }
   0x1   :  { %v15_v0 = vld [vmem:[%s577_s0] sm:$0xff]  ;;  %v380_v1 = vld [vmem:[%s577_s0 + $0x8] sm:$0xff]  ;;  %112 = vmatprep.mubr.f32.mxu0 %v430_v4  ;;  %201 = vmatprep.mubr.f32.mxu1 %v430_v4 }
   0x2   :  { %v19_v2 = vcombine.high %v15_v0, %v15_v0  ;;  %v21_v3 = vcombine.high %v380_v1, %v380_v1  ;;  %v22_v5 = vld [vmem:[%s578_s1] sm:$0xff] }
   0x3   :  { %8 = vsyncpa [#allocation3], 0  ;;  %v23_v6 = vld [vmem:[%s578_s1 + $0x8] sm:$0xff]  ;;  %v24_v7 = vld [vmem:[%s578_s1 + $0x10] sm:$0xff]  ;;  %s433_s24 = smov 1  }
   0x4   :  { %381 = vmatprep.subr.msk.mxu0 %vm39_vm0, %v19_v2  ;;  %387 = vmatprep.subr.msk.mxu1 %vm39_vm0, %v21_v3  ;;  %v25_v8 = vld [vmem:[%s578_s1 + $0x18] sm:$0xff] }
   0x5   :  { %382 = vmatpush1.msk.msra.mxu0 %vm39_vm0, %v15_v0  ;;  %388 = vmatpush1.msk.msra.mxu1 %vm39_vm0, %v380_v1 }
   0x6   :  { %383 = vmatmul.mubr.msk.f32.vlgmr.msra.gmra.mrb[0].mxu0 %vm26_vm1, %v22_v5  ;;  %389 = vmatmul.mubr.msk.f32.vlgmr.msra.gmra.mrb[0].mxu1 %vm26_vm1, %v22_v5 }
   0x7   :  { %118 = vmatprep.mubr.f32.mxu0 %v430_v4  ;;  %207 = vmatprep.mubr.f32.mxu1 %v430_v4 }
   0xa   :  { %384 = vmatmul.mubr.msk.f32.gmra.mrb[2].mxu0 %vm26_vm1, %v23_v6  ;;  %390 = vmatmul.mubr.msk.f32.gmra.mrb[2].mxu1 %vm26_vm1, %v23_v6 }
   0xb   :  { %124 = vmatprep.mubr.f32.mxu0 %v430_v4  ;;  %213 = vmatprep.mubr.f32.mxu1 %v430_v4 }
   0xe   :  { %385 = vmatmul.mubr.msk.f32.gmra.mrb[4].mxu0 %vm26_vm1, %v24_v7  ;;  %391 = vmatmul.mubr.msk.f32.gmra.mrb[4].mxu1 %vm26_vm1, %v24_v7  ;;  %v431_v7 = vmov 0  }
   0xf   :  { %130 = vmatprep.mubr.f32.mxu0 %v430_v4  ;;  %219 = vmatprep.mubr.f32.mxu1 %v430_v4 }
  0x10   :  { %400 = vset.pattern.permute.xlu1 %v431_v7 }
  0x12   :  { %386 = vmatmul.mubr.msk.f32.gmra.mrb[6].mxu0 %vm26_vm1, %v25_v8  ;;  %392 = vmatmul.mubr.msk.f32.gmra.mrb[6].mxu1 %vm26_vm1, %v25_v8 }
  0xd9   :  { %v483_v9 = vpop.f32.mrb[0].mxu0  ;;  %v485_v10 = vpop.f32.mrb[0].mxu1 }
  0xda   :  { %v487_v11 = vpop.f32.mrb[1].mxu0  ;;  %v489_v12 = vpop.f32.mrb[1].mxu1  ;;  %v228_v13 = vmul.f32 %v485_v10, %v485_v10  ;;  %v226_v14 = vmul.f32 %v483_v9, %v483_v9 }
  0xdb   :  { %v227_v15 = vmul.f32 %v487_v11, %v487_v11  ;;  %v229_v16 = vmul.f32 %v489_v12, %v489_v12 }
  0xdd   :  { %v499_v17 = vpop.f32.mrb[2].mxu0  ;;  %v501_v18 = vpop.f32.mrb[2].mxu1 }
  0xde   :  { %v230_v19 = vadd.f32 %v499_v17, %v483_v9  ;;  %v234_v20 = vmul.f32 %v499_v17, %v499_v17  ;;  %v232_v21 = vadd.f32 %v501_v18, %v485_v10  ;;  %v236_v22 = vmul.f32 %v501_v18, %v501_v18  ;;  %v511_v23 = vpop.f32.mrb[3].mxu0  ;;  %v513_v24 = vpop.f32.mrb[3].mxu1 }
  0xdf   :  { %v231_v25 = vadd.f32 %v511_v23, %v487_v11  ;;  %v235_v26 = vmul.f32 %v511_v23, %v511_v23  ;;  %v233_v27 = vadd.f32 %v513_v24, %v489_v12  ;;  %v237_v28 = vmul.f32 %v513_v24, %v513_v24 }
  0xe0   :  { %v238_v29 = vadd.f32 %v234_v20, %v226_v14  ;;  %v240_v30 = vadd.f32 %v236_v22, %v228_v13  ;;  %v282_v22 = vld [vmem:[%s579_s2] sm:$0xff]  ;;  %s434_s2 = smov [#allocation2]  }
  0xe1   :  { %v239_v31 = vadd.f32 %v235_v26, %v227_v15  ;;  %v241_v32 = vadd.f32 %v237_v28, %v229_v16  ;;  %v523_v33 = vpop.f32.mrb[4].mxu0  ;;  %v525_v34 = vpop.f32.mrb[4].mxu1  ;;  %s369_s25 = sshll.u32 %s434_s2, 4  ;;  %s558_s25 = int_to_ptr.vmem [resolvable:$true] %s369_s25 }
  0xe2   :  { %v242_v35 = vadd.f32 %v230_v19, %v523_v33  ;;  %v246_v36 = vmul.f32 %v523_v33, %v523_v33  ;;  %v244_v37 = vadd.f32 %v232_v21, %v525_v34  ;;  %v248_v38 = vmul.f32 %v525_v34, %v525_v34  ;;  %v533_v39 = vpop.f32.mrb[5].mxu0  ;;  %v535_v40 = vpop.f32.mrb[5].mxu1  ;;  %s406_s26 = scalar_lea.vmem %s558_s25, 2048  ;;  %p411_p1 = scmp.lt.s32.totalorder %s558_s25, %s558_s25 }
  0xe3   :  { %v243_v41 = vadd.f32 %v231_v25, %v533_v39  ;;  %v247_v42 = vmul.f32 %v533_v39, %v533_v39  ;;  %v245_v43 = vadd.f32 %v233_v27, %v535_v40  ;;  %v249_v44 = vmul.f32 %v535_v40, %v535_v40  ;;  %p407_p0 = scmp.ne.s32.totalorder %s558_s25, %s406_s26  ;;  %p412_p2 = scmp.lt.s32.totalorder %s406_s26, %s406_s26 }
  0xe4   :  { %v250_v45 = vadd.f32 %v246_v36, %v238_v29  ;;  %v252_v46 = vadd.f32 %v248_v38, %v240_v30  ;;  %v432_v21 = vmov 1  }
  0xe5   :  { %v251_v47 = vadd.f32 %v247_v42, %v239_v31  ;;  %v132_v48 = vpop.f32.mrb[6].mxu0  ;;  %v221_v49 = vpop.f32.mrb[6].mxu1  ;;  %v253_v50 = vadd.f32 %v249_v44, %v241_v32  ;;  %401 = vset.pattern.permute.xlu0 %v432_v21  ;;  %p413_p3 = por %p412_p2, %p411_p1 }
  0xe6   :  { %v254_v51 = vadd.f32 %v242_v35, %v132_v48  ;;  %v258_v52 = vmul.f32 %v132_v48, %v132_v48  ;;  %v256_v53 = vadd.f32 %v244_v37, %v221_v49  ;;  %v260_v54 = vmul.f32 %v221_v49, %v221_v49  ;;  %v134_v55 = vpop.f32.mrb[7].mxu0  ;;  %v223_v56 = vpop.f32.mrb[7].mxu1 }
  0xe7   :  { %v255_v57 = vadd.f32 %v243_v41, %v134_v55  ;;  %v259_v58 = vmul.f32 %v134_v55, %v134_v55  ;;  %v257_v59 = vadd.f32 %v245_v43, %v223_v56  ;;  %v261_v60 = vmul.f32 %v223_v56, %v223_v56  ;;  %p414_p4 = pnand %p413_p3, %p407_p0 }
  0xe8   :  { %v262_v61 = vadd.f32 %v258_v52, %v250_v45  ;;  %v264_v62 = vadd.f32 %v260_v54, %v252_v46 }
  0xe9   :  { %v263_v63 = vadd.f32 %v259_v58, %v251_v47  ;;  %v266_v0 = vadd.f32 %v255_v57, %v254_v51  ;;  %v265_v1 = vadd.f32 %v261_v60, %v253_v50 }
  0xeb   :  { %v267_v2 = vadd.f32 %v266_v0, %v256_v53  ;;  %v271_v3 = vadd.f32 %v263_v63, %v262_v61 }
  0xed   :  { %v268_v4 = vadd.f32 %v267_v2, %v257_v59  ;;  %v272_v5 = vadd.f32 %v271_v3, %v264_v62 }
  0xef   :  { %269 = vadd.xlane.f32.xlu0 %v268_v4  ;;  %v273_v6 = vadd.f32 %v272_v5, %v265_v1 }
  0xf3   :  { %274 = vadd.xlane.f32.xlu0 %v273_v6 }
 0x17c   :  { %v270_v8 = vpop.xlane.xlu0 %269 }
 0x17d   :  { %v276_v13 = vmul.f32 0.00048828125, %v270_v8 }
 0x17f   :  { %v278_v15 = vmul.f32 %v276_v13, %v276_v13 }
 0x180   :  { %v275_v14 = vpop.xlane.xlu0 %274 }
 0x181   :  { %v277_v16 = vmul.f32 0.00048828125, %v275_v14 }
 0x183   :  { %v279_v19 = vsub.f32 %v277_v16, %v278_v15 }
 0x185   :  { %v280_v20 = vadd.f32 1e-05, %v279_v19 }
 0x187   :  { %404 = vrsqrt.f32 %v280_v20 }
 0x191   :  { %v405_v25 = vpop.eup %404 }
 0x192   :  { %v283_v26 = vmul.f32 %v405_v25, %v282_v22 }
 0x194   :  { %v284_v27 = vmul.f32 %v283_v26, %v276_v13 }
 0x196   :  { %286 = vrot.lane.b32.xlu1 %v284_v27, %s433_s24 }
 0x19a   :  { %292 = vperm.xlu1 %400, %v283_v26  }
 0x208   :  { %v287_v28 = vpop.permute.xlu1 %286 }
 0x209   :  { %v289_v29 = vsub.f32 %v282_v22, %v287_v28 }
 0x20b   :  { %301 = vperm.xlu0 %401, %v289_v29  }
 0x219   :  { %v293_v30 = vpop.permute.xlu1 %292 }
 0x21a   :  { %v295_v31 = vmul.f32 %v293_v30, %v483_v9  ;;  %v296_v32 = vmul.f32 %v293_v30, %v487_v11  ;;  %v297_v35 = vmul.f32 %v293_v30, %v485_v10  ;;  %v298_v36 = vmul.f32 %v293_v30, %v489_v12 }
 0x21b   :  { %v316_v37 = vmul.f32 %v293_v30, %v499_v17  ;;  %v317_v38 = vmul.f32 %v293_v30, %v511_v23  ;;  %v318_v41 = vmul.f32 %v293_v30, %v501_v18  ;;  %v319_v42 = vmul.f32 %v293_v30, %v513_v24 }
 0x21c   :  { %v332_v43 = vmul.f32 %v293_v30, %v523_v33  ;;  %v333_v44 = vmul.f32 %v293_v30, %v533_v39  ;;  %v334_v9 = vmul.f32 %v293_v30, %v525_v34  ;;  %v335_v11 = vmul.f32 %v293_v30, %v535_v40 }
 0x21d   :  { %v348_v45 = vmul.f32 %v293_v30, %v132_v48  ;;  %v349_v10 = vmul.f32 %v293_v30, %v134_v55  ;;  %v350_v46 = vmul.f32 %v293_v30, %v221_v49  ;;  %v351_v12 = vmul.f32 %v293_v30, %v223_v56 }
 0x28a   :  { %v302_v47 = vpop.permute.xlu0 %301 }
 0x28b   :  { %v304_v17 = vadd.f32 %v302_v47, %v295_v31  ;;  %v305_v50 = vadd.f32 %v302_v47, %v296_v32  ;;  %v306_v23 = vadd.f32 %v302_v47, %v297_v35  ;;  %v307_v51 = vadd.f32 %v302_v47, %v298_v36 }
 0x28c   :  { %v320_v18 = vadd.f32 %v316_v37, %v302_v47  ;;  %v321_v52 = vadd.f32 %v317_v38, %v302_v47  ;;  %v322_v24 = vadd.f32 %v318_v41, %v302_v47  ;;  %v323_v53 = vadd.f32 %v319_v42, %v302_v47 }
 0x28d   :  { %v308_v33 = vmax.f32 %v304_v17, 0.0  ;;  %v309_v54 = vmax.f32 %v305_v50, 0.0  ;;  %v310_v39 = vmax.f32 %v306_v23, 0.0  ;;  %v311_v57 = vmax.f32 %v307_v51, 0.0 }
 0x28e   :  { %v324_v34 = vmax.f32 %v320_v18, 0.0  ;;  %v325_v58 = vmax.f32 %v321_v52, 0.0  ;;  %v326_v40 = vmax.f32 %v322_v24, 0.0  ;;  %v327_v48 = vmax.f32 %v323_v53, 0.0 }
 0x28f   :  { %312 = vst [vmem:[#allocation2] sm:$0xff] %v308_v33  ;;  %313 = vst [vmem:[#allocation2 + $0x8] sm:$0xff] %v309_v54  ;;  %v336_v49 = vadd.f32 %v332_v43, %v302_v47  ;;  %v337_v55 = vadd.f32 %v333_v44, %v302_v47  ;;  %v338_v56 = vadd.f32 %v334_v9, %v302_v47 }
 0x290   :  { %314 = vst [vmem:[#allocation2 + $0x10] sm:$0xff] %v310_v39  ;;  %315 = vst [vmem:[#allocation2 + $0x18] sm:$0xff] %v311_v57  ;;  %v339_v59 = vadd.f32 %v335_v11, %v302_v47  ;;  %v352_v60 = vadd.f32 %v348_v45, %v302_v47  ;;  %v353_v61 = vadd.f32 %v349_v10, %v302_v47 }
 0x291   :  { %328 = vst [vmem:[#allocation2 + $0x20] sm:$0xff] %v324_v34  ;;  %329 = vst [vmem:[#allocation2 + $0x28] sm:$0xff] %v325_v58  ;;  %v354_v62 = vadd.f32 %v350_v46, %v302_v47  ;;  %v355_v63 = vadd.f32 %v351_v12, %v302_v47  ;;  %v340_v0 = vmax.f32 %v336_v49, 0.0  ;;  %v341_v1 = vmax.f32 %v337_v55, 0.0 }
 0x292   :  { %330 = vst [vmem:[#allocation2 + $0x30] sm:$0xff] %v326_v40  ;;  %331 = vst [vmem:[#allocation2 + $0x38] sm:$0xff] %v327_v48  ;;  %v342_v2 = vmax.f32 %v338_v56, 0.0  ;;  %v343_v3 = vmax.f32 %v339_v59, 0.0  ;;  %v356_v4 = vmax.f32 %v352_v60, 0.0  ;;  %v357_v5 = vmax.f32 %v353_v61, 0.0 }
 0x293   :  { %v358_v6 = vmax.f32 %v354_v62, 0.0  ;;  %v359_v7 = vmax.f32 %v355_v63, 0.0  ;;  %344 = vst [vmem:[#allocation2 + $0x40] sm:$0xff] %v340_v0  ;;  %345 = vst [vmem:[#allocation2 + $0x48] sm:$0xff] %v341_v1 }
 0x294   :  { %346 = vst [vmem:[#allocation2 + $0x50] sm:$0xff] %v342_v2  ;;  %347 = vst [vmem:[#allocation2 + $0x58] sm:$0xff] %v343_v3 }
 0x295   :  { %360 = vst [vmem:[#allocation2 + $0x60] sm:$0xff] %v356_v4  ;;  %361 = vst [vmem:[#allocation2 + $0x68] sm:$0xff] %v357_v5 }
 0x296   :  { %362 = vst [vmem:[#allocation2 + $0x70] sm:$0xff] %v358_v6  ;;  %363 = vst [vmem:[#allocation2 + $0x78] sm:$0xff] %v359_v7 }
 0x297   :  { %417 = shalt.err (!%p414_p4)
}
 0x298   :  { %s418_s29 = scalar_lea.hbm %s580_s3, 2048 }
 0x299   :  { %p419_p5 = scmp.ne.s32.totalorder %s580_s3, %s418_s29  ;;  %p422_p6 = scmp.lt.u32.totalorder %s418_s29, %s580_s3 }
 0x29b   :  { %p424_p7 = pnand %p422_p6, %p419_p5 }
 0x29d   :  { %427 = shalt.err (!%p424_p7)
}
 0x29e   :  { %s435_s7 = smov 512   ;;  %s436_s8 = smov 32  }
 0x29f   :  { %375 = dma.vmem_to_hbm [thread:$0]  %s558_s25, 2048, %s580_s3, [#allocation3], %s435_s7, %s435_s7, %s436_s8  }
 0x2a0   :  { %428 = dma.done.wait [#allocation3], 2048  }
 0x2a1   :  { %429 = vsyncadd [#allocation3], 4294965248 }
 0x2a2   :  { %379 = vsyncpa [#allocation3], 1 }

</bundles_post_ra>
